<compile_context>
chip_gen: v7x
topology: tpu7x:2x2x1
jax: 0.10.0
libtpu: 0.0.40
codegen_flags: <defaults>
</compile_context>

<pallas_src>
import functools

import jax
import jax.numpy as jnp
from jax.experimental import pallas as pl
from jax.experimental.pallas import tpu as pltpu

BN_EPS = 1e-5
HIDDEN = 16
VMEM_LIMIT = 32 * 1024 * 1024  # fits v5e/v6e/v7x scoped budgets; kernel uses ~4-5 MiB


def _round_up(x, m):
    return (x + m - 1) // m * m


def _stats_kernel(n_total, needs_mask, xt_ref, w1b_ref, sum_ref, sumsq_ref):
    # xt_ref:  [F+1, tb]   (batch on lanes)
    # w1b_ref: [HIDDEN, F+2]  (cols 0..F = w1^T, col F+1 = b1)
    # sum_ref / sumsq_ref: [1, HIDDEN, 1] per-tile partial sums of relu(fc1)
    fp1 = xt_ref.shape[0]
    tb = xt_ref.shape[1]
    w1t = w1b_ref[:, :fp1]                       # [16, F+1]
    b1 = w1b_ref[:, fp1:fp1 + 1]                 # [16, 1]
    h = jnp.dot(w1t, xt_ref[...], preferred_element_type=jnp.float32) + b1
    h = jnp.maximum(h, 0.0)                      # [16, tb]
    if needs_mask:  # static: only when the last tile is partial (zero OOB lanes)
        col = pl.program_id(0) * tb + jax.lax.broadcasted_iota(jnp.int32, (1, tb), 1)
        h = jnp.where(col < n_total, h, 0.0)
    sum_ref[...] = jnp.sum(h, axis=1, keepdims=True).reshape(sum_ref.shape)
    sumsq_ref[...] = jnp.sum(h * h, axis=1, keepdims=True).reshape(sumsq_ref.shape)


def _apply_kernel(classify, xt_ref, w1b_ref, head_ref, out_ref):
    # head_ref: [1, HIDDEN+1] = [w2*bn_scale | w2.bn_shift + b2]  (BN folded into the head)
    # out_ref:  [1, 1, tb]  lane-dense over batch
    fp1 = xt_ref.shape[0]
    w1t = w1b_ref[:, :fp1]                       # [16, F+1]
    b1 = w1b_ref[:, fp1:fp1 + 1]                 # [16, 1]
    h = jnp.dot(w1t, xt_ref[...], preferred_element_type=jnp.float32) + b1
    h = jnp.maximum(h, 0.0)                      # [16, tb]
    w2row = head_ref[:, :HIDDEN]                 # [1, 16]
    b2 = head_ref[:, HIDDEN:HIDDEN + 1]          # [1, 1]
    y = jnp.dot(w2row, h, preferred_element_type=jnp.float32) + b2   # [1, tb]
    if classify:
        y = jax.nn.sigmoid(y)
    out_ref[...] = y.reshape(out_ref.shape)


@functools.partial(jax.jit, static_argnames=("classify", "block_n"))
def mlp_forward(params, x, t, *, classify=0, block_n=32768):
    """x: [N, F] f32, t: [N] or [N, 1] -> [N, 1] f32 (forward of the PyTorch MLP)."""
    n, f = x.shape
    fp1 = f + 1

    # Lane-dense input layout: xt = [x^T ; t] of shape [F+1, N] (one extra XLA pass over x,
    # reused by both kernel passes -> (F+1, tb) VMEM blocks, contiguous tb*4-byte DMA rows).
    xt = jnp.concatenate(
        [x.T.astype(jnp.float32), t.reshape(1, n).astype(jnp.float32)], axis=0)

    # Packed fc1 params: [w1^T | b1] -> [HIDDEN, F+2]
    w1b = jnp.concatenate(
        [params["w1"].T.astype(jnp.float32),
         params["b1"].reshape(HIDDEN, 1).astype(jnp.float32)], axis=1)

    tb = int(min(_round_up(block_n, 128), _round_up(n, 128)))
    num_tiles = -(-n // tb)
    needs_mask = (num_tiles * tb) != n

    common = dict(
        grid=(num_tiles,),
        compiler_params=pltpu.CompilerParams(
            dimension_semantics=("parallel",),   # pure batch-tile parallelism (both v7x TCs)
            vmem_limit_bytes=VMEM_LIMIT),
    )

    # ---- Pass 1: per-tile sum / sum-of-squares of relu(fc1) ------------------------------
    sums, sumsqs = pl.pallas_call(
        functools.partial(_stats_kernel, int(n), needs_mask),
        out_shape=(jax.ShapeDtypeStruct((num_tiles, HIDDEN, 1), jnp.float32),
                   jax.ShapeDtypeStruct((num_tiles, HIDDEN, 1), jnp.float32)),
        in_specs=[pl.BlockSpec((fp1, tb), lambda i: (0, i)),
                  pl.BlockSpec((HIDDEN, fp1 + 1), lambda i: (0, 0))],
        out_specs=(pl.BlockSpec((1, HIDDEN, 1), lambda i: (i, 0, 0)),
                   pl.BlockSpec((1, HIDDEN, 1), lambda i: (i, 0, 0))),
        **common,
    )(xt, w1b)

    # ---- Finalize batch stats in XLA (tiny) and fold BN + fc2 into one affine head -------
    s = sums.reshape(num_tiles, HIDDEN)
    ss = sumsqs.reshape(num_tiles, HIDDEN)
    counts = jnp.minimum(tb, n - jnp.arange(num_tiles) * tb).astype(jnp.float32)
    mean = jnp.sum(s, axis=0) / n                                   # [HIDDEN]
    tile_mean = s / counts[:, None]
    tile_m2 = jnp.maximum(ss - s * tile_mean, 0.0)                  # per-tile M2
    m2 = jnp.sum(tile_m2, axis=0) + jnp.sum(
        counts[:, None] * (tile_mean - mean) ** 2, axis=0)          # Chan combine
    var = m2 / n                                                    # biased (BN training)
    scale = params["gamma"].astype(jnp.float32) / jnp.sqrt(var + BN_EPS)
    shift = params["beta"].astype(jnp.float32) - mean * scale
    w2 = params["w2"].reshape(HIDDEN).astype(jnp.float32)
    w2_eff = w2 * scale
    b2_eff = jnp.sum(w2 * shift) + jnp.asarray(params["b2"], jnp.float32)
    head = jnp.concatenate([w2_eff.reshape(1, HIDDEN), b2_eff.reshape(1, 1)], axis=1)

    # ---- Pass 2: recompute relu(fc1) per tile and apply the folded head ------------------
    out = pl.pallas_call(
        functools.partial(_apply_kernel, bool(classify)),
        out_shape=jax.ShapeDtypeStruct((num_tiles, 1, tb), jnp.float32),
        in_specs=[pl.BlockSpec((fp1, tb), lambda i: (0, i)),
                  pl.BlockSpec((HIDDEN, fp1 + 1), lambda i: (0, 0)),
                  pl.BlockSpec((1, HIDDEN + 1), lambda i: (0, 0))],
        out_specs=pl.BlockSpec((1, 1, tb), lambda i: (i, 0, 0)),
        **common,
    )(xt, w1b, head)

    return out.reshape(-1)[:n].reshape(n, 1)


def init_params(key, n_features):
    """Torch-like init: Linear uniform(+-1/sqrt(fan_in)), BN weight=1, bias=0."""
    in1 = n_features + 1
    k1, k2, k3, k4 = jax.random.split(key, 4)
    bound1 = 1.0 / (in1 ** 0.5)
    bound2 = 1.0 / (HIDDEN ** 0.5)
    return {
        # stored as [in, out] (transpose of torch's [out, in])
        "w1": jax.random.uniform(k1, (in1, HIDDEN), jnp.float32, -bound1, bound1),
        "b1": jax.random.uniform(k2, (HIDDEN,), jnp.float32, -bound1, bound1),
        "gamma": jnp.ones((HIDDEN,), jnp.float32),
        "beta": jnp.zeros((HIDDEN,), jnp.float32),
        "w2": jax.random.uniform(k3, (HIDDEN,), jnp.float32, -bound2, bound2),
        "b2": jax.random.uniform(k4, (), jnp.float32, -bound2, bound2),
    }


def _reference(x, t, params, classify):
    din = jnp.concatenate([x, t.reshape(-1, 1)], axis=-1).astype(jnp.float32)
    h = jnp.maximum(din @ params["w1"] + params["b1"], 0.0)
    mean = jnp.mean(h, axis=0, keepdims=True)
    var = jnp.mean((h - mean) ** 2, axis=0, keepdims=True)
    hn = (h - mean) / jnp.sqrt(var + BN_EPS) * params["gamma"] + params["beta"]
    y = hn @ params["w2"].reshape(HIDDEN, 1) + params["b2"]
    return jax.nn.sigmoid(y) if classify else y


if __name__ == "__main__":
    key = jax.random.PRNGKey(0)
    kx, kt, kp, kx2, kt2 = jax.random.split(key, 5)

    batch, n_features = 8, 4
    x = jax.random.normal(kx, (batch, n_features), jnp.float32)          # data.x
    t = jax.random.bernoulli(kt, 0.5, (batch, 1)).astype(jnp.float32)    # data.t
    params = init_params(kp, n_features)

    for classify in (1, 0):
        out = mlp_forward(params, x, t, classify=classify)
        jax.block_until_ready(out)
        assert out.shape == (batch, 1), out.shape
        ref = _reference(x, t, params, classify)
        err = float(jnp.max(jnp.abs(out - ref)))
        assert jnp.allclose(out, ref, atol=1e-4, rtol=1e-4), err

    # Multi-tile + partial-last-tile path (exercises masking and the Chan variance combine).
    batch2 = 300
    x2 = jax.random.normal(kx2, (batch2, n_features), jnp.float32)
    t2 = jax.random.bernoulli(kt2, 0.5, (batch2, 1)).astype(jnp.float32)
    out2 = mlp_forward(params, x2, t2, classify=0, block_n=128)
    jax.block_until_ready(out2)
    assert out2.shape == (batch2, 1), out2.shape
    ref2 = _reference(x2, t2, params, 0)
    err2 = float(jnp.max(jnp.abs(out2 - ref2)))
    assert jnp.allclose(out2, ref2, atol=1e-4, rtol=1e-4), err2

    print("KERNEL_OK")
</pallas_src>

<mosaic_0001>
module attributes {stable_mosaic.version = 11 : i64} {
  func.func @_stats_kernel(%arg0: i32, %arg1: memref<5x128xf32, #tpu.memory_space<vmem>>, %arg2: memref<16x6xf32, #tpu.memory_space<vmem>>, %arg3: memref<1x16x1xf32, #tpu.memory_space<vmem>>, %arg4: memref<1x16x1xf32, #tpu.memory_space<vmem>>) attributes {dimension_semantics = [#tpu.dimension_semantics<parallel>], iteration_bounds = array<i64: 1>, scalar_prefetch = 0 : i64, scratch_operands = 0 : i64, tpu.core_type = #tpu.core_type<tc>, window_params = [{transform_indices = @transform_0, window_bounds = array<i64: 5, 128>}, {pipeline_mode = #tpu.pipeline_mode<synchronous>, transform_indices = @transform_1, window_bounds = array<i64: 16, 6>}, {transform_indices = @transform_2, window_bounds = array<i64: 1, 16, 1>}, {transform_indices = @transform_3, window_bounds = array<i64: 1, 16, 1>}]} {
    %c0 = arith.constant 0 : index
    %c0_0 = arith.constant 0 : index
    %0 = vector.load %arg2[%c0, %c0_0] : memref<16x6xf32, #tpu.memory_space<vmem>>, vector<16x5xf32>
    %c0_1 = arith.constant 0 : index
    %c5 = arith.constant 5 : index
    %1 = vector.load %arg2[%c0_1, %c5] : memref<16x6xf32, #tpu.memory_space<vmem>>, vector<16x1xf32>
    %c0_2 = arith.constant 0 : index
    %c0_3 = arith.constant 0 : index
    %2 = vector.load %arg1[%c0_2, %c0_3] : memref<5x128xf32, #tpu.memory_space<vmem>>, vector<5x128xf32>
    %cst = arith.constant dense<0.000000e+00> : vector<16x128xf32>
    %3 = tpu.matmul %0, %2, %cst {dimension_numbers = #tpu.dot_dimension_numbers<[1], [0], [0], [1], [0, 0, 1, 1], [], []>} : vector<16x5xf32>, vector<5x128xf32>, vector<16x128xf32> -> vector<16x128xf32>
    %4 = vector.broadcast %1 : vector<16x1xf32> to vector<16x128xf32>
    %5 = arith.addf %3, %4 : vector<16x128xf32>
    %cst_4 = arith.constant 0.000000e+00 : f32
    %6 = vector.broadcast %cst_4 : f32 to vector<16x128xf32>
    %7 = arith.maximumf %5, %6 : vector<16x128xf32>
    %c128_i32 = arith.constant 128 : i32
    %8 = arith.muli %arg0, %c128_i32 : i32
    %9 = tpu.iota {dimensions = array<i32: 1>} : vector<1x128xi32>
    %10 = vector.broadcast %8 : i32 to vector<1x128xi32>
    %11 = arith.addi %10, %9 : vector<1x128xi32>
    %c8_i32 = arith.constant 8 : i32
    %12 = vector.broadcast %c8_i32 : i32 to vector<1x128xi32>
    %13 = arith.cmpi slt, %11, %12 : vector<1x128xi32>
    %cst_5 = arith.constant 0.000000e+00 : f32
    %14 = vector.shape_cast %13 : vector<1x128xi1> to vector<1x128xi1>
    %15 = vector.broadcast %14 : vector<1x128xi1> to vector<16x128xi1>
    %16 = vector.broadcast %cst_5 : f32 to vector<16x128xf32>
    %17 = arith.select %15, %7, %16 : vector<16x128xi1>, vector<16x128xf32>
    %cst_6 = arith.constant dense<0.000000e+00> : vector<16xf32>
    %18 = vector.multi_reduction <add>, %17, %cst_6 [1] : vector<16x128xf32> to vector<16xf32>
    %19 = vector.shape_cast %18 : vector<16xf32> to vector<16x1xf32>
    %20 = vector.shape_cast %19 : vector<16x1xf32> to vector<1x16x1xf32>
    %c0_7 = arith.constant 0 : index
    %c0_8 = arith.constant 0 : index
    %c0_9 = arith.constant 0 : index
    %21 = vector.load %arg3[%c0_7, %c0_8, %c0_9] : memref<1x16x1xf32, #tpu.memory_space<vmem>>, vector<1x16x1xf32>
    tpu.vector_store %arg3[%c0_7, %c0_8, %c0_9], %20 {strides = array<i32>} : memref<1x16x1xf32, #tpu.memory_space<vmem>>, vector<1x16x1xf32>,
    %22 = arith.mulf %17, %17 : vector<16x128xf32>
    %cst_10 = arith.constant dense<0.000000e+00> : vector<16xf32>
    %23 = vector.multi_reduction <add>, %22, %cst_10 [1] : vector<16x128xf32> to vector<16xf32>
    %24 = vector.shape_cast %23 : vector<16xf32> to vector<16x1xf32>
    %25 = vector.shape_cast %24 : vector<16x1xf32> to vector<1x16x1xf32>
    %c0_11 = arith.constant 0 : index
    %c0_12 = arith.constant 0 : index
    %c0_13 = arith.constant 0 : index
    %26 = vector.load %arg4[%c0_11, %c0_12, %c0_13] : memref<1x16x1xf32, #tpu.memory_space<vmem>>, vector<1x16x1xf32>
    tpu.vector_store %arg4[%c0_11, %c0_12, %c0_13], %25 {strides = array<i32>} : memref<1x16x1xf32, #tpu.memory_space<vmem>>, vector<1x16x1xf32>,
    return
  }
  func.func @transform_0(%arg0: i32) -> (i32, i32) {
    %c0_i32 = arith.constant 0 : i32
    %c0_i32_0 = arith.constant 0 : i32
    return %c0_i32, %arg0 : i32, i32
  }
  func.func @transform_1(%arg0: i32) -> (i32, i32) {
    %c0_i32 = arith.constant 0 : i32
    %c0_i32_0 = arith.constant 0 : i32
    %c0_i32_1 = arith.constant 0 : i32
    return %c0_i32, %c0_i32_0 : i32, i32
  }
  func.func @transform_2(%arg0: i32) -> (i32, i32, i32) {
    %c0_i32 = arith.constant 0 : i32
    %c0_i32_0 = arith.constant 0 : i32
    %c0_i32_1 = arith.constant 0 : i32
    return %arg0, %c0_i32, %c0_i32_0 : i32, i32, i32
  }
  func.func @transform_3(%arg0: i32) -> (i32, i32, i32) {
    %c0_i32 = arith.constant 0 : i32
    %c0_i32_0 = arith.constant 0 : i32
    %c0_i32_1 = arith.constant 0 : i32
    return %arg0, %c0_i32, %c0_i32_0 : i32, i32, i32
  }
}

module attributes {stable_mosaic.version = 11 : i64} {
  func.func @_apply_kernel(%arg0: i32, %arg1: memref<5x128xf32, #tpu.memory_space<vmem>>, %arg2: memref<16x6xf32, #tpu.memory_space<vmem>>, %arg3: memref<1x17xf32, #tpu.memory_space<vmem>>, %arg4: memref<1x1x128xf32, #tpu.memory_space<vmem>>) attributes {dimension_semantics = [#tpu.dimension_semantics<parallel>], iteration_bounds = array<i64: 1>, scalar_prefetch = 0 : i64, scratch_operands = 0 : i64, tpu.core_type = #tpu.core_type<tc>, window_params = [{transform_indices = @transform_0, window_bounds = array<i64: 5, 128>}, {pipeline_mode = #tpu.pipeline_mode<synchronous>, transform_indices = @transform_1, window_bounds = array<i64: 16, 6>}, {pipeline_mode = #tpu.pipeline_mode<synchronous>, transform_indices = @transform_2, window_bounds = array<i64: 1, 17>}, {transform_indices = @transform_3, window_bounds = array<i64: 1, 1, 128>}]} {
    %c0 = arith.constant 0 : index
    %c0_0 = arith.constant 0 : index
    %0 = vector.load %arg2[%c0, %c0_0] : memref<16x6xf32, #tpu.memory_space<vmem>>, vector<16x5xf32>
    %c0_1 = arith.constant 0 : index
    %c5 = arith.constant 5 : index
    %1 = vector.load %arg2[%c0_1, %c5] : memref<16x6xf32, #tpu.memory_space<vmem>>, vector<16x1xf32>
    %c0_2 = arith.constant 0 : index
    %c0_3 = arith.constant 0 : index
    %2 = vector.load %arg1[%c0_2, %c0_3] : memref<5x128xf32, #tpu.memory_space<vmem>>, vector<5x128xf32>
    %cst = arith.constant dense<0.000000e+00> : vector<16x128xf32>
    %3 = tpu.matmul %0, %2, %cst {dimension_numbers = #tpu.dot_dimension_numbers<[1], [0], [0], [1], [0, 0, 1, 1], [], []>} : vector<16x5xf32>, vector<5x128xf32>, vector<16x128xf32> -> vector<16x128xf32>
    %4 = vector.broadcast %1 : vector<16x1xf32> to vector<16x128xf32>
    %5 = arith.addf %3, %4 : vector<16x128xf32>
    %cst_4 = arith.constant 0.000000e+00 : f32
    %6 = vector.broadcast %cst_4 : f32 to vector<16x128xf32>
    %7 = arith.maximumf %5, %6 : vector<16x128xf32>
    %c0_5 = arith.constant 0 : index
    %c0_6 = arith.constant 0 : index
    %8 = vector.load %arg3[%c0_5, %c0_6] : memref<1x17xf32, #tpu.memory_space<vmem>>, vector<1x16xf32>
    %c0_7 = arith.constant 0 : index
    %c16 = arith.constant 16 : index
    %9 = vector.load %arg3[%c0_7, %c16] : memref<1x17xf32, #tpu.memory_space<vmem>>, vector<1x1xf32>
    %cst_8 = arith.constant dense<0.000000e+00> : vector<1x128xf32>
    %10 = tpu.matmul %8, %7, %cst_8 {dimension_numbers = #tpu.dot_dimension_numbers<[1], [0], [0], [1], [0, 0, 1, 1], [], []>} : vector<1x16xf32>, vector<16x128xf32>, vector<1x128xf32> -> vector<1x128xf32>
    %11 = vector.broadcast %9 : vector<1x1xf32> to vector<1x128xf32>
    %12 = arith.addf %10, %11 : vector<1x128xf32>
    %13 = arith.negf %12 : vector<1x128xf32>
    %14 = math.exp %13 : vector<1x128xf32>
    %cst_9 = arith.constant 1.000000e+00 : f32
    %15 = vector.broadcast %cst_9 : f32 to vector<1x128xf32>
    %16 = arith.addf %15, %14 : vector<1x128xf32>
    %17 = arith.divf %15, %16 : vector<1x128xf32>
    %18 = vector.shape_cast %17 : vector<1x128xf32> to vector<1x1x128xf32>
    %c0_10 = arith.constant 0 : index
    %c0_11 = arith.constant 0 : index
    %c0_12 = arith.constant 0 : index
    %19 = vector.load %arg4[%c0_10, %c0_11, %c0_12] : memref<1x1x128xf32, #tpu.memory_space<vmem>>, vector<1x1x128xf32>
    tpu.vector_store %arg4[%c0_10, %c0_11, %c0_12], %18 {strides = array<i32>} : memref<1x1x128xf32, #tpu.memory_space<vmem>>, vector<1x1x128xf32>,
    return
  }
  func.func @transform_0(%arg0: i32) -> (i32, i32) {
    %c0_i32 = arith.constant 0 : i32
    %c0_i32_0 = arith.constant 0 : i32
    return %c0_i32, %arg0 : i32, i32
  }
  func.func @transform_1(%arg0: i32) -> (i32, i32) {
    %c0_i32 = arith.constant 0 : i32
    %c0_i32_0 = arith.constant 0 : i32
    %c0_i32_1 = arith.constant 0 : i32
    return %c0_i32, %c0_i32_0 : i32, i32
  }
  func.func @transform_2(%arg0: i32) -> (i32, i32) {
    %c0_i32 = arith.constant 0 : i32
    %c0_i32_0 = arith.constant 0 : i32
    %c0_i32_1 = arith.constant 0 : i32
    return %c0_i32, %c0_i32_0 : i32, i32
  }
  func.func @transform_3(%arg0: i32) -> (i32, i32, i32) {
    %c0_i32 = arith.constant 0 : i32
    %c0_i32_0 = arith.constant 0 : i32
    %c0_i32_1 = arith.constant 0 : i32
    return %arg0, %c0_i32, %c0_i32_0 : i32, i32, i32
  }
}

</mosaic_0001>

<bundles_post_ra>
// kernel: mlp_forward.2
= control target key start
LH: loop header
LB: loop body
LE: loop exit
PB: predicated region body
PF: predicated region fallthrough
CT: control target
= control target key end

     0   :  { %vm31_vm0 = vcmask 1044480   ;;  %vm26_vm1 = vcmask 39936   ;;  %v158_v3 = vmov 5   ;;  %v113_v5 = vlaneseq  ;;  %s200_s0 = inlined_call_operand.vmem [shape: f32[5,8], index: 0, kind: input, shape index: {}]   ;;  %s201_s1 = inlined_call_operand.vmem [shape: f32[16,6], index: 1, kind: input, shape index: {}]   ;;  %s202_s2 = inlined_call_operand.vmem [shape: f32[1,16,1], index: 2, kind: output, shape index: {0}]   ;;  %s203_s3 = inlined_call_operand.vmem [shape: f32[1,16,1], index: 3, kind: output, shape index: {1}]  }
   0x1   :  { %v15_v0 = vld [vmem:[%s200_s0] sm:$0x1f]  ;;  %v14_v2 = vld [vmem:[%s201_s1 + $0x8] sm:$0xff]  ;;  %157 = vset.pattern.permute.xlu0 %v158_v3  ;;  %vm126_vm3 = vcmask 7168  }
   0x2   :  { %v13_v1 = vld [vmem:[%s201_s1] sm:$0xff]  ;;  %151 = vmatprep.subr.msk.mxu0 %vm31_vm0, %v15_v0  ;;  %v114_v6 = vand.u32 127, %v113_v5 }
   0x3   :  { %153 = vmatprep.mubr.msk.f32.mxu0 %vm26_vm1, %v13_v1  ;;  %152 = vmatpush3.msk.msra.mxu0 %vm31_vm0, %v15_v0 }
   0x4   :  { %18 = vperm.xlu0 %157, %v13_v1   ;;  %154 = vmatmul.mubr.msk.f32.vlgmr.msra.gmra.mrb[0].mxu0 %vm26_vm1, %v14_v2  ;;  %vm117_vm2 = vcmp.lt.s32.totalorder %v114_v6, 8 }
   0x8   :  { %23 = vperm.xlu0 %157, %v14_v2  }
  0x83   :  { %v19_v4 = vpop.permute.xlu0 %18 }
  0x87   :  { %v24_v7 = vpop.permute.xlu0 %23 }
  0xd7   :  { %v155_v8 = vpop.f32.mrb[0].mxu0 }
  0xd8   :  { %v107_v9 = vadd.f32 %v155_v8, %v24_v7  ;;  %v101_v10 = vpop.f32.mrb[1].mxu0 }
  0xd9   :  { %v102_v11 = vadd.f32 %v101_v10, %v19_v4 }
  0xda   :  { %v111_v12 = vmax.f32 %v107_v9, 0.0 }
  0xdb   :  { %v110_v13 = vmax.f32 %v102_v11, 0.0 }
  0xdc   :  { %v121_v14 = vsel %vm117_vm2, %v111_v12, 0.0 }
  0xdd   :  { %124 = vadd.xlane.f32.xlu1 %v121_v14  ;;  %v120_v15 = vsel %vm117_vm2, %v110_v13, 0.0  ;;  %v130_v17 = vmul.f32 %v121_v14, %v121_v14 }
  0xde   :  { %v129_v16 = vmul.f32 %v120_v15, %v120_v15 }
  0xe0   :  { %131 = vadd.xlane.f32.xlu0 %v129_v16 }
  0xe1   :  { %122 = vadd.xlane.f32.xlu1 %v120_v15 }
  0xe5   :  { %133 = vadd.xlane.f32.xlu1 %v130_v17 }
 0x16a   :  { %v125_v18 = vpop.xlane.xlu1 %124 }
 0x16b   :  { %128 = vst.msk [vmem:[%s202_s2 + $0x8] sm:$0xff] %vm126_vm3, %v125_v18 }
 0x16d   :  { %v132_v19 = vpop.xlane.xlu0 %131 }
 0x16e   :  { %135 = vst.msk [vmem:[%s203_s3] sm:$0xff] %vm126_vm3, %v132_v19  ;;  %v123_v20 = vpop.xlane.xlu1 %122 }
 0x16f   :  { %127 = vst.msk [vmem:[%s202_s2] sm:$0xff] %vm126_vm3, %v123_v20 }
 0x172   :  { %v134_v21 = vpop.xlane.xlu1 %133 }
 0x173   :  { %136 = vst.msk [vmem:[%s203_s3 + $0x8] sm:$0xff] %vm126_vm3, %v134_v21 }

// kernel: mlp_forward.3
= control target key start
LH: loop header
LB: loop body
LE: loop exit
PB: predicated region body
PF: predicated region fallthrough
CT: control target
= control target key end

     0   :  { %vm32_vm0 = vcmask 1044480   ;;  %vm27_vm1 = vcmask 39936   ;;  %v245_v3 = vmov 5   ;;  %v246_v4 = vmov 0.0|0.0   ;;  %s285_s0 = inlined_call_operand.vmem [shape: f32[5,8], index: 0, kind: input, shape index: {}]   ;;  %s286_s1 = inlined_call_operand.vmem [shape: f32[16,6], index: 1, kind: input, shape index: {}]   ;;  %s287_s2 = inlined_call_operand.vmem [shape: f32[1,17], index: 2, kind: input, shape index: {}]   ;;  %s288_s3 = inlined_call_operand.vmem [shape: f32[1,1,128], index: 3, kind: output, shape index: {}]  }
   0x1   :  { %v16_v0 = vld [vmem:[%s285_s0] sm:$0x1f]  ;;  %v15_v2 = vld [vmem:[%s286_s1 + $0x8] sm:$0xff]  ;;  %238 = vset.pattern.permute.xlu0 %v245_v3  ;;  %230 = vmatprep.subr.bf16.mxu1 %v246_v4  ;;  %vm247_vm2 = vmmov 0   ;;  %v248_v5 = vmov 0.0   ;;  %v249_v7 = vmov 16   ;;  %v119_v17 = vlaneseq }
   0x2   :  { %v14_v1 = vld [vmem:[%s286_s1] sm:$0xff]  ;;  %218 = vmatprep.subr.msk.mxu0 %vm32_vm0, %v16_v0  ;;  %227 = vmatprep.mubr.msk.f32.mxu1 %vm247_vm2, %v248_v5  ;;  %vm123_vm3 = vcmask 130048  }
   0x3   :  { %220 = vmatprep.mubr.msk.f32.mxu0 %vm27_vm1, %v14_v1  ;;  %219 = vmatpush3.msk.msra.mxu0 %vm32_vm0, %v16_v0  ;;  %v113_v6 = vld [vmem:[%s287_s2] sm:$0x1]  ;;  %v120_v18 = vshrl.u32 %v119_v17, 7 }
   0x4   :  { %19 = vperm.xlu0 %238, %v14_v1   ;;  %221 = vmatmul.mubr.msk.f32.vlgmr.msra.gmra.mrb[0].mxu0 %vm27_vm1, %v15_v2 }
   0x5   :  { %239 = vset.pattern.permute.xlu1 %v249_v7  ;;  %v121_v19 = vsub.s32 0, %v120_v18 }
   0x6   :  { %116 = vperm.xlu1 %239, %v113_v6  }
   0x8   :  { %24 = vperm.xlu0 %238, %v15_v2  }
   0xc   :  { %240 = vset.pattern.permute.xlu0 %v249_v7 }
  0x83   :  { %v20_v8 = vpop.permute.xlu0 %19 }
  0x85   :  { %v117_v20 = vpop.permute.xlu1 %116 }
  0x86   :  { %v122_v21 = vrot.slane %v117_v20, %v121_v19 }
  0x87   :  { %v25_v9 = vpop.permute.xlu0 %24 }
  0xd7   :  { %v222_v10 = vpop.f32.mrb[0].mxu0 }
  0xd8   :  { %v108_v11 = vadd.f32 %v222_v10, %v25_v9  ;;  %v102_v12 = vpop.f32.mrb[1].mxu0 }
  0xd9   :  { %v103_v13 = vadd.f32 %v102_v12, %v20_v8 }
  0xda   :  { %v112_v14 = vmax.f32 %v108_v11, 0.0 }
  0xdb   :  { %v111_v15 = vmax.f32 %v103_v13, 0.0 }
  0xdd   :  { %v231_v16 = vpack.c.bf16 %v112_v14, %v111_v15 }
  0xdf   :  { %232 = vmatpush3.bf16.msra.mxu1 %v231_v16 }
  0xe2   :  { %228 = vmatmul.mubr.msk.f32.vlgmr.msra.gmra.mrb[0].mxu1 %vm123_vm3, %v113_v6 }
 0x1b5   :  { %v192_v22 = vpop.f32.mrb[0].mxu1 }
 0x1b6   :  { %v193_v23 = vadd.f32 %v192_v22, %v122_v21  ;;  %v229_v24 = vpop.f32.mrb[1].mxu1 }
 0x1b8   :  { %v211_v25 = vmul.f32 -1.442695, %v193_v23 }
 0x1ba   :  { %241 = vpow2.f32 %v211_v25 }
 0x1c4   :  { %v242_v26 = vpop.eup %241 }
 0x1c5   :  { %v199_v27 = vadd.f32 1.0, %v242_v26 }
 0x1c7   :  { %243 = vrcp.f32 %v199_v27 }
 0x1d1   :  { %v244_v28 = vpop.eup %243 }
 0x1d2   :  { %202 = vst [vmem:[%s288_s3] sm:$0x1] %v244_v28 }

</bundles_post_ra>
